<compile_context>
chip_gen: v7x
topology: tpu7x:2x2x1
jax: 0.10.0
libtpu: 0.0.40
codegen_flags: <defaults>
</compile_context>

<pallas_src>
import math
import functools

import jax
import jax.numpy as jnp
import numpy as np
from jax.experimental import pallas as pl
from jax.experimental.pallas import tpu as pltpu

_SHIFT = math.log(2.0)  # matches torch.log(torch.tensor(2.0)).item()

# Cheap, VPU-only activations that are numerically safe directly in the input dtype.
_NATIVE_DTYPE_ACTS = frozenset({"relu", "leaky_relu", "softsign"})

# Rough transcendental-op count per element (for pl.CostEstimate).
_TRANSCENDENTALS_PER_ELEM = {
    "relu": 0, "leaky_relu": 0, "softsign": 0,
    "sp": 2, "leaky_sp": 2, "ssp": 2, "leaky_ssp": 2,
    "elu": 1, "leaky_elu": 1,
    "tanh": 1, "leaky_tanh": 1, "swish": 1,
}


def _softplus(x):
    # Stable softplus using only exp/log (guaranteed Mosaic/EUP lowering):
    #   softplus(x) = max(x, 0) + log(1 + exp(-|x|))
    return jnp.maximum(x, 0.0) + jnp.log(1.0 + jnp.exp(-jnp.abs(x)))


def _sigmoid(x):
    # 1 / (1 + exp(-x)); stable for f32 (overflow of exp -> inf -> result 0).
    return 1.0 / (1.0 + jnp.exp(-x))


def _elu(x):
    # exp(x) - 1 on the negative branch; inf on the discarded branch is harmless.
    return jnp.where(x > 0, x, jnp.exp(x) - 1.0)


def _compute_act(x, act, slope):
    if act == "relu":
        return jnp.maximum(x, 0.0)
    elif act == "leaky_relu":
        # F.leaky_relu default negative_slope = 0.01
        return jnp.where(x >= 0, x, 0.01 * x)
    elif act == "sp":
        return _softplus(x)
    elif act == "leaky_sp":
        return _softplus(x) - slope * jnp.maximum(-x, 0.0)
    elif act == "elu":
        return _elu(x)
    elif act == "leaky_elu":
        return _elu(x) - slope * jnp.maximum(-x, 0.0)
    elif act == "ssp":
        return _softplus(x) - _SHIFT
    elif act == "leaky_ssp":
        return _softplus(x) - slope * jnp.maximum(-x, 0.0) - _SHIFT
    elif act == "tanh":
        return jnp.tanh(x)
    elif act == "leaky_tanh":
        return jnp.tanh(x) + slope * x
    elif act == "swish":
        return _sigmoid(x) * x
    elif act == "softsign":
        return x / (1.0 + jnp.abs(x))
    else:
        raise RuntimeError(f"Undefined activation called {act}")


def _act_kernel(x_ref, o_ref, *, act, slope):
    x = x_ref[...]
    if act not in _NATIVE_DTYPE_ACTS:
        x = x.astype(jnp.float32)
    y = _compute_act(x, act, slope)
    o_ref[...] = y.astype(o_ref.dtype)


@functools.lru_cache(maxsize=1)
def _tpu_generation_params():
    """Returns (target_block_bytes, vmem_limit_bytes or None), generation-aware."""
    kind = ""
    try:
        kind = (getattr(jax.devices()[0], "device_kind", "") or "").lower()
    except Exception:
        pass
    if "v7" in kind:
        # 3.2 TB/s HBM: 8 MiB blocks; 4 live buffers = 32 MiB hits the scoped
        # default, so raise the limit (physical VMEM is 64 MiB / TC).
        return 8 << 20, 48 << 20
    if "v6" in kind:
        # 1.3-1.4 TB/s: 4 MiB blocks (16 MiB live); explicit limit just for headroom.
        return 4 << 20, 48 << 20
    # v5e / unknown: 2 MiB blocks stay under the 16 MiB scoped default.
    return 2 << 20, None


def _choose_geometry(n, itemsize, target_block_bytes):
    """Pick (lane width W, block_rows, rows).

    W: widest power-of-two multiple of 128 (<= 4096) dividing n, preferring widths
    that keep >= row_align rows.  block_rows targets `target_block_bytes`, is a
    multiple of the native sublane tile, and is capped so the grid has >= 4 steps
    when the tensor is big enough (pipelining + v7x 2-core balance).
    """
    row_align = max(8, 32 // itemsize)          # 8 f32, 16 bf16, 32 int8/fp8
    target_block_elems = max(row_align * 128, target_block_bytes // itemsize)
    min_steps = 4

    width = None
    w = 128
    while w <= 4096:
        if n % w == 0 and n // w >= row_align:
            width = w
        w *= 2
    if width is None:                            # small input: any dividing width
        w = 128
        while w <= 4096:
            if n % w == 0:
                width = w
                break
            w *= 2
    if width is None:
        width = 128                              # ragged: caller pads the tail

    rows = pl.cdiv(n, width)

    if rows <= row_align:
        return width, rows, rows                 # single full-extent block

    block_rows = min(rows, max(row_align, target_block_elems // width))
    if rows >= min_steps * row_align:
        # Guarantee >= min_steps grid steps while keeping >= row_align rows/step.
        block_rows = min(block_rows, pl.cdiv(rows, min_steps))
    block_rows = max(row_align, (block_rows // row_align) * row_align)
    return width, block_rows, rows


def act_pallas(x, act, slope=0.05, *, donate_input=False):
    """Elementwise activation matching torch Act.forward, via a Pallas TPU kernel."""
    orig_shape = x.shape
    dtype = x.dtype
    n = x.size
    if n == 0:
        return x

    itemsize = jnp.dtype(dtype).itemsize
    target_block_bytes, vmem_limit = _tpu_generation_params()
    width, block_rows, rows = _choose_geometry(n, itemsize, target_block_bytes)
    needs_pad = (n % width) != 0

    if needs_pad:
        # Ragged: pad only the <=width-1 element tail (Pallas masks partial blocks).
        flat = jnp.pad(x.reshape(-1), (0, rows * width - n))
        slab = flat.reshape(rows, width)
    else:
        # Zero-copy fast path: pure reshape (any size divisible by 128).
        slab = x.reshape(rows, width)

    grid = (pl.cdiv(rows, block_rows),)
    kernel = functools.partial(_act_kernel, act=act, slope=slope)

    compiler_kwargs = dict(dimension_semantics=("parallel",))
    if vmem_limit is not None:
        compiler_kwargs["vmem_limit_bytes"] = vmem_limit
    if needs_pad:
        # Let XLA fuse the pad into the kernel's input read (avoids an HBM pass).
        compiler_kwargs["allow_input_fusion"] = [True]

    cost = pl.CostEstimate(
        flops=4 * n,
        transcendentals=_TRANSCENDENTALS_PER_ELEM[act] * n,
        bytes_accessed=2 * n * itemsize,
    )

    out = pl.pallas_call(
        kernel,
        out_shape=jax.ShapeDtypeStruct((rows, width), dtype),
        grid_spec=pltpu.PrefetchScalarGridSpec(
            num_scalar_prefetch=0,
            grid=grid,
            in_specs=[pl.BlockSpec((block_rows, width), lambda i: (i, 0))],
            out_specs=pl.BlockSpec((block_rows, width), lambda i: (i, 0)),
        ),
        compiler_params=pltpu.CompilerParams(**compiler_kwargs),
        cost_estimate=cost,
        input_output_aliases=({0: 0} if (donate_input and not needs_pad) else {}),
    )(slab)

    if needs_pad:
        # TODO(synk): the output tail slice is still one extra HBM pass on the rare
        # ragged path; an in-kernel masked tail store would remove it.
        return out.reshape(-1)[:n].reshape(orig_shape)
    return out.reshape(orig_shape)


def act_reference(x, act, slope=0.05):
    return _compute_act(x.astype(jnp.float32), act, slope).astype(x.dtype)


def _to_np_f32(a):
    return np.asarray(a.astype(jnp.float32))


if __name__ == "__main__":
    key = jax.random.PRNGKey(0)
    acts = [
        "relu", "leaky_relu", "sp", "leaky_sp", "elu", "leaky_elu",
        "ssp", "leaky_ssp", "tanh", "leaky_tanh", "swish", "softsign",
    ]

    # Typical NCHW-style input: batch=2, channels=4, 16x16 spatial.
    x = jax.random.normal(key, (2, 4, 16, 16), dtype=jnp.float32) * 3.0
    for act in acts:
        y = jax.block_until_ready(act_pallas(x, act, slope=0.05))
        y_ref = act_reference(x, act, slope=0.05)
        np.testing.assert_allclose(np.asarray(y), np.asarray(y_ref),
                                   rtol=1e-5, atol=1e-5)
        assert y.shape == x.shape and y.dtype == x.dtype

    # bf16 input: cheap activations stay bf16, transcendental ones upcast to f32.
    xb = x.astype(jnp.bfloat16)
    for act in ("relu", "swish", "leaky_ssp"):
        y = jax.block_until_ready(act_pallas(xb, act, slope=0.05))
        y_ref = act_reference(xb, act, slope=0.05)
        np.testing.assert_allclose(_to_np_f32(y), _to_np_f32(y_ref),
                                   rtol=2e-2, atol=2e-2)
        assert y.shape == xb.shape and y.dtype == xb.dtype

    # Ragged size (not a multiple of 128) exercises the tail-pad fallback path.
    xr = jax.random.normal(jax.random.PRNGKey(1), (2, 3, 5, 7), dtype=jnp.float32)
    y = jax.block_until_ready(act_pallas(xr, "leaky_ssp", slope=0.05))
    np.testing.assert_allclose(np.asarray(y),
                               np.asarray(act_reference(xr, "leaky_ssp", slope=0.05)),
                               rtol=1e-5, atol=1e-5)
    assert y.shape == xr.shape and y.dtype == xr.dtype

    # Larger input exercises the multi-step (>=4) pipelined grid geometry.
    xl = jax.random.normal(jax.random.PRNGKey(2), (8, 64, 64, 64), dtype=jnp.float32)
    y = jax.block_until_ready(act_pallas(xl, "swish", slope=0.05))
    np.testing.assert_allclose(np.asarray(y),
                               np.asarray(act_reference(xl, "swish", slope=0.05)),
                               rtol=1e-5, atol=1e-5)
    assert y.shape == xl.shape and y.dtype == xl.dtype

    print("KERNEL_OK")
</pallas_src>

<mosaic_0001>
module attributes {stable_mosaic.version = 11 : i64} {
  func.func @_act_kernel(%arg0: i32, %arg1: memref<8x256xf32, #tpu.memory_space<vmem>>, %arg2: memref<8x256xf32, #tpu.memory_space<vmem>>) attributes {dimension_semantics = [#tpu.dimension_semantics<parallel>], iteration_bounds = array<i64: 1>, scalar_prefetch = 0 : i64, scratch_operands = 0 : i64, tpu.core_type = #tpu.core_type<tc>, window_params = [{transform_indices = @transform_0, window_bounds = array<i64: 8, 256>}, {transform_indices = @transform_1, window_bounds = array<i64: 8, 256>}]} {
    %c0 = arith.constant 0 : index
    %c0_0 = arith.constant 0 : index
    %0 = vector.load %arg1[%c0, %c0_0] : memref<8x256xf32, #tpu.memory_space<vmem>>, vector<8x256xf32>
    %cst = arith.constant 0.000000e+00 : f32
    %1 = vector.broadcast %cst : f32 to vector<8x256xf32>
    %2 = arith.maximumf %0, %1 : vector<8x256xf32>
    %c0_1 = arith.constant 0 : index
    %c0_2 = arith.constant 0 : index
    %3 = vector.load %arg2[%c0_1, %c0_2] : memref<8x256xf32, #tpu.memory_space<vmem>>, vector<8x256xf32>
    tpu.vector_store %arg2[%c0_1, %c0_2], %2 {strides = array<i32>} : memref<8x256xf32, #tpu.memory_space<vmem>>, vector<8x256xf32>,
    return
  }
  func.func @transform_0(%arg0: i32) -> (i32, i32) {
    %c0_i32 = arith.constant 0 : i32
    %c0_i32_0 = arith.constant 0 : i32
    return %arg0, %c0_i32 : i32, i32
  }
  func.func @transform_1(%arg0: i32) -> (i32, i32) {
    %c0_i32 = arith.constant 0 : i32
    %c0_i32_0 = arith.constant 0 : i32
    return %arg0, %c0_i32 : i32, i32
  }
}

</mosaic_0001>

<bundles_post_ra>
// kernel: tpu_custom_call.1
= control target key start
LH: loop header
LB: loop body
LE: loop exit
PB: predicated region body
PF: predicated region fallthrough
CT: control target
= control target key end

     0   :  { %6 = vsyncpa [#allocation3], 0  ;;  %s128_s0 = inlined_call_operand.hbm [shape: f32[8,256], index: 0, kind: input, shape index: {}]   ;;  %s129_s1 = inlined_call_operand.hbm [shape: f32[8,256], index: 1, kind: output, shape index: {}]  }
   0x1   :  { %7 = vsyncpa [#allocation4], 0  ;;  %s92_s6 = smov [#allocation2]   ;;  %s44_s10 = scalar_lea.hbm %s128_s0, 256 }
   0x2   :  { %s14_s7 = sshll.u32 %s92_s6, 4  ;;  %p45_p0 = scmp.ne.s32.totalorder %s128_s0, %s44_s10  ;;  %s15_s7 = int_to_ptr.vmem [resolvable:$true] %s14_s7 }
   0x3   :  { %p48_p1 = scmp.lt.u32.totalorder %s44_s10, %s128_s0 }
   0x5   :  { %p50_p2 = pnand %p48_p1, %p45_p0 }
   0x7   :  { %53 = shalt.err (!%p50_p2)
}
   0x8   :  { %s54_s15 = scalar_lea.vmem %s15_s7, 256  ;;  %p59_p4 = scmp.lt.s32.totalorder %s15_s7, %s15_s7 }
   0x9   :  { %p55_p3 = scmp.ne.s32.totalorder %s15_s7, %s54_s15  ;;  %p60_p5 = scmp.lt.s32.totalorder %s54_s15, %s54_s15 }
   0xb   :  { %p61_p6 = por %p60_p5, %p59_p4 }
   0xd   :  { %p62_p7 = pnand %p61_p6, %p55_p3 }
   0xf   :  { %65 = shalt.err (!%p62_p7)
}
  0x10   :  { %17 = dma.hbm_to_vmem [thread:$0]  %s128_s0, 256, %s15_s7, [#allocation3]  }
  0x11   :  { %88 = dma.done.wait [#allocation3], 256  }
  0x12   :  { %89 = vsyncadd [#allocation3], 4294967040  ;;  %s93_s18 = smov [#allocation5]   ;;  %v21_v0 = vld [vmem:[#allocation2] sm:$0xff]  ;;  %v22_v1 = vld [vmem:[#allocation2 + $0x8] sm:$0xff] }
  0x13   :  { %s33_s19 = sshll.u32 %s93_s18, 4  ;;  %v23_v2 = vmax.f32 %v21_v0, 0.0  ;;  %v24_v3 = vmax.f32 %v22_v1, 0.0  ;;  %s34_s19 = int_to_ptr.vmem [resolvable:$true] %s33_s19 }
  0x14   :  { %s66_s20 = scalar_lea.vmem %s34_s19, 256  ;;  %p71_p9 = scmp.lt.s32.totalorder %s34_s19, %s34_s19 }
  0x15   :  { %25 = vst [vmem:[#allocation5] sm:$0xff] %v23_v2  ;;  %26 = vst [vmem:[#allocation5 + $0x8] sm:$0xff] %v24_v3  ;;  %p67_p8 = scmp.ne.s32.totalorder %s34_s19, %s66_s20  ;;  %p72_p10 = scmp.lt.s32.totalorder %s66_s20, %s66_s20 }
  0x17   :  { %p73_p11 = por %p72_p10, %p71_p9 }
  0x19   :  { %p74_p12 = pnand %p73_p11, %p67_p8 }
  0x1b   :  { %77 = shalt.err (!%p74_p12)
}
  0x1c   :  { %s78_s22 = scalar_lea.hbm %s129_s1, 256 }
  0x1d   :  { %p79_p13 = scmp.ne.s32.totalorder %s129_s1, %s78_s22  ;;  %p82_p0 = scmp.lt.u32.totalorder %s78_s22, %s129_s1 }
  0x1f   :  { %p84_p1 = pnand %p82_p0, %p79_p13 }
  0x21   :  { %87 = shalt.err (!%p84_p1)
}
  0x22   :  { %36 = dma.vmem_to_hbm [thread:$0]  %s34_s19, 256, %s129_s1, [#allocation4]  }
  0x23   :  { %90 = dma.done.wait [#allocation4], 256  }
  0x24   :  { %91 = vsyncadd [#allocation4], 4294967040 }
  0x25   :  { %40 = vsyncpa [#allocation3], 1 }
  0x26   :  { %41 = vsyncpa [#allocation4], 1 }

</bundles_post_ra>
